<compile_context>
chip_gen: v5e
topology: v5e:2x2
jax: 0.10.0
libtpu: 0.0.40
codegen_flags: <defaults>
</compile_context>

<pallas_src>
import numpy as np
import jax
import jax.numpy as jnp
from jax import lax
from jax.experimental import pallas as pl
from jax.experimental.pallas import tpu as pltpu

LANES = 512            # lane-dense last dim (multiple of 128)
MAX_BLOCK_ROWS = 1024  # 1024 x 512 x 4 B = 2 MiB f32 block (safe on v5e/v6e/v7x)


# --------------------------------------------------------------------------
# Kernel 1: global min/max reduction -> per-block vector partials (parallel)
# --------------------------------------------------------------------------
def _make_minmax_kernel(block_rows, rows_total, need_mask):
    def kernel(x_ref, min_ref, max_ref):
        x = x_ref[...].astype(jnp.float32)
        if need_mask:
            # last grid block overhangs the array: mask out-of-range rows with
            # +inf / -inf neutral values so unspecified data never pollutes.
            i = pl.program_id(0)
            row = i * block_rows + lax.broadcasted_iota(jnp.int32, x.shape, 0)
            valid = row < rows_total
            x_min = jnp.where(valid, x, jnp.inf)
            x_max = jnp.where(valid, x, -jnp.inf)
        else:
            x_min = x
            x_max = x
        # VPU fold across sublanes -> (1, LANES) vector partial; the scalar
        # reduce of all partials happens once in the wrapper (tiny XLA op).
        pmin = jnp.min(x_min, axis=0, keepdims=True)
        pmax = jnp.max(x_max, axis=0, keepdims=True)
        min_ref[...] = jnp.broadcast_to(pmin, min_ref.shape)
        max_ref[...] = jnp.broadcast_to(pmax, max_ref.shape)

    return kernel


def _global_min_max(x2d, block_rows):
    rows = x2d.shape[0]
    n_blocks = pl.cdiv(rows, block_rows)
    need_mask = (rows % block_rows) != 0
    kernel = _make_minmax_kernel(block_rows, rows, need_mask)
    pmin, pmax = pl.pallas_call(
        kernel,
        out_shape=(jax.ShapeDtypeStruct((n_blocks * 8, LANES), jnp.float32),
                   jax.ShapeDtypeStruct((n_blocks * 8, LANES), jnp.float32)),
        grid=(n_blocks,),
        in_specs=[pl.BlockSpec((block_rows, LANES), lambda i: (i, 0))],
        out_specs=(pl.BlockSpec((8, LANES), lambda i: (i, 0)),
                   pl.BlockSpec((8, LANES), lambda i: (i, 0))),
        compiler_params=pltpu.CompilerParams(
            dimension_semantics=("parallel",)),  # megacore-parallel on v7x
    )(x2d)
    return jnp.min(pmin), jnp.max(pmax)


# --------------------------------------------------------------------------
# Kernel 2: clamp + fake-quantize (quantize -> dequantize) elementwise
# --------------------------------------------------------------------------
def _fake_quant_kernel(params_ref, x_ref, o_ref):
    # params_ref (SMEM, float32[5]): [actual_min, actual_max, scale, zero_point, inv_scale]
    amin = params_ref[0]
    amax = params_ref[1]
    scale = params_ref[2]
    zp = params_ref[3]
    inv_scale = params_ref[4]
    x = x_ref[...].astype(jnp.float32)
    x = jnp.clip(x, amin, amax)                   # distiller clamp(...)
    q = jnp.round(scale * x - zp)                 # linear_quantize
    o_ref[...] = ((q + zp) * inv_scale).astype(o_ref.dtype)  # linear_dequantize


def _fake_quant(x2d, params, block_rows):
    rows = x2d.shape[0]
    n_blocks = pl.cdiv(rows, block_rows)
    return pl.pallas_call(
        _fake_quant_kernel,
        out_shape=jax.ShapeDtypeStruct(x2d.shape, x2d.dtype),
        grid=(n_blocks,),
        in_specs=[pl.BlockSpec(memory_space=pltpu.MemorySpace.SMEM),
                  pl.BlockSpec((block_rows, LANES), lambda i: (i, 0))],
        out_specs=pl.BlockSpec((block_rows, LANES), lambda i: (i, 0)),
        compiler_params=pltpu.CompilerParams(
            dimension_semantics=("parallel",)),
    )(params, x2d)


# --------------------------------------------------------------------------
# Helpers
# --------------------------------------------------------------------------
def _prep(x):
    """Flatten to a lane-dense (rows, LANES) view, padding at most LANES-1
    elements (edge values, so min/max is unaffected)."""
    flat = x.reshape(-1)
    total = flat.shape[0]
    padded = pl.cdiv(total, LANES) * LANES
    pad = padded - total
    if pad:
        flat = jnp.pad(flat, (0, pad), mode="edge")
    rows = padded // LANES
    # block row dim must be divisible by 8 or equal the full array dim
    block_rows = rows if rows <= MAX_BLOCK_ROWS else MAX_BLOCK_ROWS
    return flat.reshape(rows, LANES), total, pad, block_rows


# --------------------------------------------------------------------------
# Module-equivalent: state buffers + forward
# --------------------------------------------------------------------------
def init_state(ema_decay=0.999):
    # mirrors FakeLinearQuantization.__init__ registered buffers (all shape (1,))
    return dict(
        ema_decay=jnp.asarray(ema_decay, jnp.float32),
        tracked_min_biased=jnp.zeros((1,), jnp.float32),
        tracked_min=jnp.zeros((1,), jnp.float32),
        tracked_max_biased=jnp.zeros((1,), jnp.float32),
        tracked_max=jnp.zeros((1,), jnp.float32),
        iter_count=jnp.zeros((1,), jnp.float32),
        scale=jnp.ones((1,), jnp.float32),
        zero_point=jnp.zeros((1,), jnp.float32),
    )


def update_ema(biased_ema, value, decay, step):
    biased_ema = biased_ema * decay + (1.0 - decay) * value
    unbiased_ema = biased_ema / (1.0 - decay ** step)
    return biased_ema, unbiased_ema


def fake_linear_quantization_forward(x, state, num_bits=8, training=True):
    """Forward pass of FakeLinearQuantization (SYMMETRIC mode, dequantize=True).

    Returns (output with x's original shape/dtype, updated state dict).
    """
    # TODO(synk): ASYMMETRIC_UNSIGNED / ASYMMETRIC_SIGNED / SYMMETRIC_RESTRICTED
    # modes not implemented; default LinearQuantMode.SYMMETRIC only.
    orig_shape = x.shape
    x2d, total, pad, block_rows = _prep(x)

    state = dict(state)
    decay = state["ema_decay"]

    if training:
        cur_min, cur_max = _global_min_max(x2d, block_rows)   # Pallas reduction
        state["iter_count"] = state["iter_count"] + 1.0
        state["tracked_min_biased"], state["tracked_min"] = update_ema(
            state["tracked_min_biased"], cur_min, decay, state["iter_count"])
        state["tracked_max_biased"], state["tracked_max"] = update_ema(
            state["tracked_max_biased"], cur_max, decay, state["iter_count"])

    # SYMMETRIC: max_abs and symmetric_linear_quantization_params (restrict_qrange=False)
    max_abs = jnp.maximum(jnp.abs(state["tracked_min"]), jnp.abs(state["tracked_max"]))
    actual_min, actual_max = -max_abs, max_abs
    if training:
        n = (2.0 ** num_bits - 1.0) / 2.0
        sat = jnp.where(max_abs == 0.0, n, max_abs)
        state["scale"] = n / sat
        state["zero_point"] = jnp.zeros_like(state["scale"])

    inv_scale = 1.0 / state["scale"]   # hoisted reciprocal (kernel multiplies)
    params = jnp.concatenate(
        [actual_min, actual_max, state["scale"], state["zero_point"], inv_scale]
    ).astype(jnp.float32)

    out2d = _fake_quant(x2d, params, block_rows)              # Pallas elementwise
    if pad:
        out = out2d.reshape(-1)[:total].reshape(orig_shape)
    else:
        out = out2d.reshape(orig_shape)
    return out, state


# --------------------------------------------------------------------------
# Reference (numpy) for a sanity check of one training step
# --------------------------------------------------------------------------
def _reference(xn, num_bits=8, decay=0.999):
    cur_min, cur_max = xn.min(), xn.max()
    itc = 1.0
    tmin_b = 0.0 * decay + (1 - decay) * cur_min
    tmin = tmin_b / (1 - decay ** itc)
    tmax_b = 0.0 * decay + (1 - decay) * cur_max
    tmax = tmax_b / (1 - decay ** itc)
    max_abs = max(abs(tmin), abs(tmax))
    n = (2 ** num_bits - 1) / 2.0
    sat = n if max_abs == 0 else max_abs
    scale = n / sat
    zp = 0.0
    clamped = np.clip(xn, -max_abs, max_abs)
    q = np.round(scale * clamped - zp)
    return (q + zp) / scale


if __name__ == "__main__":
    # --- small NCHW activation (single block, no padding) ---
    key = jax.random.PRNGKey(0)
    x = jax.random.normal(key, (2, 4, 16, 16), dtype=jnp.float32) * 3.0

    state = init_state(ema_decay=0.999)
    out, new_state = fake_linear_quantization_forward(x, state, num_bits=8, training=True)
    out = jax.block_until_ready(out)

    ref = _reference(np.asarray(x, dtype=np.float32))
    assert out.shape == x.shape
    np.testing.assert_allclose(np.asarray(out), ref, rtol=1e-5, atol=1e-5)

    # --- larger activation: exercises multi-block grid, masked partial
    #     reduction block and partial elementwise block ---
    key2 = jax.random.PRNGKey(1)
    xb = jax.random.normal(key2, (4, 8, 160, 160), dtype=jnp.float32) * 3.0
    state_b = init_state(ema_decay=0.999)
    out_b, new_state_b = fake_linear_quantization_forward(xb, state_b, num_bits=8,
                                                          training=True)
    out_b = jax.block_until_ready(out_b)
    xb_np = np.asarray(xb, dtype=np.float32)

    # masked reduction must recover the exact global min / max (EMA at step 1
    # equals the current extrema up to f32 rounding)
    np.testing.assert_allclose(float(new_state_b["tracked_max"][0]), xb_np.max(), rtol=1e-5)
    np.testing.assert_allclose(float(new_state_b["tracked_min"][0]), xb_np.min(), rtol=1e-5)

    # elementwise fake-quant checked against the state-derived f32 parameters
    tmin = np.float32(new_state_b["tracked_min"][0])
    tmax = np.float32(new_state_b["tracked_max"][0])
    max_abs_b = np.float32(max(abs(tmin), abs(tmax)))
    scale_b = np.float32(new_state_b["scale"][0])
    inv_scale_b = np.float32(1.0) / scale_b
    clamped_b = np.clip(xb_np, -max_abs_b, max_abs_b).astype(np.float32)
    q_b = np.round((scale_b * clamped_b).astype(np.float32))
    ref_b = (q_b.astype(np.float32) * inv_scale_b).astype(np.float32)
    np.testing.assert_allclose(np.asarray(out_b), ref_b, rtol=1e-5, atol=1e-5)

    print("KERNEL_OK")
</pallas_src>

<mosaic_0001>
module attributes {stable_mosaic.version = 11 : i64} {
  func.func @kernel(%arg0: i32, %arg1: memref<4x512xf32, #tpu.memory_space<vmem>>, %arg2: memref<8x512xf32, #tpu.memory_space<vmem>>, %arg3: memref<8x512xf32, #tpu.memory_space<vmem>>) attributes {dimension_semantics = [#tpu.dimension_semantics<parallel>], iteration_bounds = array<i64: 1>, scalar_prefetch = 0 : i64, scratch_operands = 0 : i64, tpu.core_type = #tpu.core_type<tc>, window_params = [{transform_indices = @transform_0, window_bounds = array<i64: 4, 512>}, {transform_indices = @transform_1, window_bounds = array<i64: 8, 512>}, {transform_indices = @transform_2, window_bounds = array<i64: 8, 512>}]} {
    %c0 = arith.constant 0 : index
    %c0_0 = arith.constant 0 : index
    %0 = vector.load %arg1[%c0, %c0_0] : memref<4x512xf32, #tpu.memory_space<vmem>>, vector<4x512xf32>
    %cst = arith.constant dense<0x7F800000> : vector<512xf32>
    %1 = vector.multi_reduction <minimumf>, %0, %cst [0] : vector<4x512xf32> to vector<512xf32>
    %2 = vector.shape_cast %1 : vector<512xf32> to vector<1x512xf32>
    %cst_1 = arith.constant dense<0xFF800000> : vector<512xf32>
    %3 = vector.multi_reduction <maximumf>, %0, %cst_1 [0] : vector<4x512xf32> to vector<512xf32>
    %4 = vector.shape_cast %3 : vector<512xf32> to vector<1x512xf32>
    %5 = vector.shape_cast %2 : vector<1x512xf32> to vector<1x512xf32>
    %6 = vector.broadcast %5 : vector<1x512xf32> to vector<8x512xf32>
    %c0_2 = arith.constant 0 : index
    %c0_3 = arith.constant 0 : index
    %7 = vector.load %arg2[%c0_2, %c0_3] : memref<8x512xf32, #tpu.memory_space<vmem>>, vector<8x512xf32>
    tpu.vector_store %arg2[%c0_2, %c0_3], %6 {strides = array<i32>} : memref<8x512xf32, #tpu.memory_space<vmem>>, vector<8x512xf32>,
    %8 = vector.shape_cast %4 : vector<1x512xf32> to vector<1x512xf32>
    %9 = vector.broadcast %8 : vector<1x512xf32> to vector<8x512xf32>
    %c0_4 = arith.constant 0 : index
    %c0_5 = arith.constant 0 : index
    %10 = vector.load %arg3[%c0_4, %c0_5] : memref<8x512xf32, #tpu.memory_space<vmem>>, vector<8x512xf32>
    tpu.vector_store %arg3[%c0_4, %c0_5], %9 {strides = array<i32>} : memref<8x512xf32, #tpu.memory_space<vmem>>, vector<8x512xf32>,
    return
  }
  func.func @transform_0(%arg0: i32) -> (i32, i32) {
    %c0_i32 = arith.constant 0 : i32
    %c0_i32_0 = arith.constant 0 : i32
    return %arg0, %c0_i32 : i32, i32
  }
  func.func @transform_1(%arg0: i32) -> (i32, i32) {
    %c0_i32 = arith.constant 0 : i32
    %c0_i32_0 = arith.constant 0 : i32
    return %arg0, %c0_i32 : i32, i32
  }
  func.func @transform_2(%arg0: i32) -> (i32, i32) {
    %c0_i32 = arith.constant 0 : i32
    %c0_i32_0 = arith.constant 0 : i32
    return %arg0, %c0_i32 : i32, i32
  }
}

</mosaic_0001>

<bundles_post_ra>
// kernel: tpu_custom_call.1
= control target key start
LH: loop header
LB: loop body
LE: loop exit
PB: predicated region body
PF: predicated region fallthrough
CT: control target
= control target key end

     0   :  { %8 = vsyncpa [#allocation3], 0  ;;  %s266_s0 = inlined_call_operand.hbm [shape: f32[4,512], index: 0, kind: input, shape index: {}]   ;;  %s267_s1 = inlined_call_operand.hbm [shape: f32[8,512], index: 1, kind: output, shape index: {0}]   ;;  %s268_s2 = inlined_call_operand.hbm [shape: f32[8,512], index: 2, kind: output, shape index: {1}]  }
   0x1   :  { %9 = vsyncpa [#allocation4], 0 }
   0x2   :  { %10 = vsyncpa [#allocation7], 0  ;;  %s16_s11 = sshll.u32 %s266_s0, 4  ;;  %s231_s12 = smov [#allocation2]   ;;  %s17_s11 = int_to_ptr.hbm [resolvable:$true] %s16_s11 }
   0x3   :  { %s18_s13 = sshll.u32 %s231_s12, 4  ;;  %s19_s13 = int_to_ptr.vmem [resolvable:$true] %s18_s13 }
   0x4   :  { %21 = dma.hbm_to_vmem [thread:$0]  %s17_s11, 256, %s19_s13, [#allocation3]  }
   0x5   :  { %225 = dma.done.wait [#allocation3], 256  }
   0x6   :  { %226 = vsyncadd [#allocation3], 4294967040  ;;  %v26_v0 = vld [vmem:[#allocation2] sm:$0xff]  ;;  %v27_v1 = vld [vmem:[#allocation2 + $0x8] sm:$0xff]  ;;  %vm41_vm0 = vcmask 1043456   ;;  %s124_s15 = sshll.u32 %s267_s1, 4  ;;  %s125_s15 = int_to_ptr.hbm [resolvable:$true] %s124_s15 }
   0x7   :  { %30 = vst [vmem:[#allocation1] ss:$2 sm:$0xff] %v26_v0  ;;  %s232_s16 = smov [#allocation5]   ;;  %s233_s1 = smov [#allocation6]  }
   0x8   :  { %32 = vst [vmem:[#allocation1 + $0x10] ss:$2 sm:$0xff] %v27_v1  ;;  %s122_s17 = sshll.u32 %s232_s16, 4  ;;  %s133_s18 = sshll.u32 %s233_s1, 4  ;;  %s123_s17 = int_to_ptr.vmem [resolvable:$true] %s122_s17  ;;  %s134_s18 = int_to_ptr.vmem [resolvable:$true] %s133_s18 }
   0x9   :  { %s135_s21 = sshll.u32 %s268_s2, 4  ;;  %s136_s21 = int_to_ptr.hbm [resolvable:$true] %s135_s21 }
   0xe   :  { %v33_v2 = vld.sshfl [vmem:[#allocation1] sm:$0xff pattern:$0x75316420]  ;;  %v34_v3 = vld.sshfl [vmem:[#allocation1 + $0x8] sm:$0xff pattern:$0x75316420] }
   0xf   :  { %70 = vst [vmem:[#allocation1] ss:$2 sm:$0xff] %v26_v0  ;;  %v35_v4 = vld.sshfl [vmem:[#allocation1 + $0x10] sm:$0xff pattern:$0x75316420]  ;;  %v42_v5 = vsel %vm41_vm0, %v33_v2, inf }
  0x10   :  { %v36_v6 = vld.sshfl [vmem:[#allocation1 + $0x18] sm:$0xff pattern:$0x75316420]  ;;  %v43_v7 = vrot.slane %v42_v5, 4  ;;  %v49_v8 = vsel %vm41_vm0, %v34_v3, inf  ;;  %v56_v9 = vsel %vm41_vm0, %v35_v4, inf }
  0x11   :  { %72 = vst [vmem:[#allocation1 + $0x10] ss:$2 sm:$0xff] %v27_v1  ;;  %v50_v10 = vrot.slane %v49_v8, 4  ;;  %v57_v11 = vrot.slane %v56_v9, 4  ;;  %v63_v12 = vsel %vm41_vm0, %v36_v6, inf }
  0x12   :  { %v44_v13 = vmin.f32 %v42_v5, %v43_v7  ;;  %v64_v14 = vrot.slane %v63_v12, 4 }
  0x13   :  { %v51_v15 = vmin.f32 %v49_v8, %v50_v10  ;;  %v58_v16 = vmin.f32 %v56_v9, %v57_v11 }
  0x14   :  { %v45_v17 = vrot.slane %v44_v13, 2  ;;  %v65_v18 = vmin.f32 %v63_v12, %v64_v14 }
  0x15   :  { %v52_v19 = vrot.slane %v51_v15, 2  ;;  %v59_v20 = vrot.slane %v58_v16, 2 }
  0x16   :  { %v46_v21 = vmin.f32 %v44_v13, %v45_v17  ;;  %v66_v22 = vrot.slane %v65_v18, 2  ;;  %v73_v23 = vld.sshfl [vmem:[#allocation1] sm:$0xff pattern:$0x75316420] }
  0x17   :  { %v53_v24 = vmin.f32 %v51_v15, %v52_v19  ;;  %v60_v25 = vmin.f32 %v58_v16, %v59_v20  ;;  %v81_v26 = vsel %vm41_vm0, %v73_v23, -inf  ;;  %v74_v27 = vld.sshfl [vmem:[#allocation1 + $0x8] sm:$0xff pattern:$0x75316420] }
  0x18   :  { %v47_v28 = vrot.slane %v46_v21, 1  ;;  %v67_v29 = vmin.f32 %v65_v18, %v66_v22  ;;  %v82_v30 = vrot.slane %v81_v26, 4  ;;  %v88_v31 = vsel %vm41_vm0, %v74_v27, -inf  ;;  %v75_v32 = vld.sshfl [vmem:[#allocation1 + $0x10] sm:$0xff pattern:$0x75316420] }
  0x19   :  { %v54_v33 = vrot.slane %v53_v24, 1  ;;  %v61_v34 = vrot.slane %v60_v25, 1  ;;  %v89_v35 = vrot.slane %v88_v31, 4  ;;  %v95_v36 = vsel %vm41_vm0, %v75_v32, -inf }
  0x1a   :  { %v48_v37 = vmin.f32 %v46_v21, %v47_v28  ;;  %v68_v38 = vrot.slane %v67_v29, 1  ;;  %v83_v39 = vmax.f32 %v81_v26, %v82_v30  ;;  %v96_v40 = vrot.slane %v95_v36, 4  ;;  %v76_v41 = vld.sshfl [vmem:[#allocation1 + $0x18] sm:$0xff pattern:$0x75316420] }
  0x1b   :  { %v55_v42 = vmin.f32 %v53_v24, %v54_v33  ;;  %v62_v43 = vmin.f32 %v60_v25, %v61_v34  ;;  %v90_v44 = vmax.f32 %v88_v31, %v89_v35  ;;  %v102_v45 = vsel %vm41_vm0, %v76_v41, -inf }
  0x1c   :  { %109 = vst [vmem:[#allocation5] sm:$0xff] %v48_v37  ;;  %v69_v46 = vmin.f32 %v67_v29, %v68_v38  ;;  %v84_v47 = vrot.slane %v83_v39, 2  ;;  %v97_v48 = vmax.f32 %v95_v36, %v96_v40  ;;  %v103_v49 = vrot.slane %v102_v45, 4 }
  0x1d   :  { %110 = vst [vmem:[#allocation5 + $0x8] sm:$0xff] %v55_v42  ;;  %v91_v50 = vrot.slane %v90_v44, 2 }
  0x1e   :  { %111 = vst [vmem:[#allocation5 + $0x10] sm:$0xff] %v62_v43  ;;  %v85_v51 = vmax.f32 %v83_v39, %v84_v47  ;;  %v98_v52 = vrot.slane %v97_v48, 2  ;;  %v104_v53 = vmax.f32 %v102_v45, %v103_v49 }
  0x1f   :  { %112 = vst [vmem:[#allocation5 + $0x18] sm:$0xff] %v69_v46  ;;  %v92_v54 = vmax.f32 %v90_v44, %v91_v50 }
  0x20   :  { %v86_v55 = vrot.slane %v85_v51, 1  ;;  %v99_v56 = vmax.f32 %v97_v48, %v98_v52  ;;  %v105_v57 = vrot.slane %v104_v53, 2  ;;  %127 = dma.vmem_to_hbm [thread:$0]  %s123_s17, 512, %s125_s15, [#allocation4]  }
  0x21   :  { %v93_v58 = vrot.slane %v92_v54, 1 }
  0x22   :  { %v87_v59 = vmax.f32 %v85_v51, %v86_v55  ;;  %v100_v60 = vrot.slane %v99_v56, 1  ;;  %v106_v61 = vmax.f32 %v104_v53, %v105_v57 }
  0x23   :  { %v94_v62 = vmax.f32 %v92_v54, %v93_v58 }
  0x24   :  { %113 = vst [vmem:[#allocation6] sm:$0xff] %v87_v59  ;;  %v101_v63 = vmax.f32 %v99_v56, %v100_v60  ;;  %v107_v0 = vrot.slane %v106_v61, 1 }
  0x25   :  { %114 = vst [vmem:[#allocation6 + $0x8] sm:$0xff] %v94_v62 }
  0x26   :  { %115 = vst [vmem:[#allocation6 + $0x10] sm:$0xff] %v101_v63  ;;  %v108_v1 = vmax.f32 %v106_v61, %v107_v0 }
  0x28   :  { %116 = vst [vmem:[#allocation6 + $0x18] sm:$0xff] %v108_v1 }
  0x29   :  { %138 = dma.vmem_to_hbm [thread:$0]  %s134_s18, 512, %s136_s21, [#allocation7]  }
  0x2a   :  { %227 = dma.done.wait [#allocation4], 512  }
  0x2b   :  { %228 = vsyncadd [#allocation4], 4294966784 }
  0x2c   :  { %229 = dma.done.wait [#allocation7], 512  }
  0x2d   :  { %230 = vsyncadd [#allocation7], 4294966784 }
  0x2e   :  { %147 = vsyncpa [#allocation3], 1 }
  0x2f   :  { %148 = vsyncpa [#allocation4], 1 }
  0x30   :  { %149 = vsyncpa [#allocation7], 1 }

</bundles_post_ra>
